<compile_context>
chip_gen: v7x
topology: tpu7x:2x2x1
jax: 0.10.0
libtpu: 0.0.40
codegen_flags: <defaults>
</compile_context>

<pallas_src>
import functools

import jax
import jax.numpy as jnp
from jax.experimental import pallas as pl
from jax.experimental.pallas import tpu as pltpu

_INV_SQRT3 = 0.5773502691896258
_MAX_PRIMS_PER_STEP = 8
_PARAMS_PER_PRIM = 27


# --------------------------------------------------------------------------
# Shared per-primitive coverage evaluation (xx/yy are reused across prims)
# --------------------------------------------------------------------------
def _render_one(params_ref, off, xx, yy, out_ref, j):
    """params_ref: 1D SMEM f32; off: scalar base offset of this primitive.
    Writes premultiplied RGBA planes for primitive slot j of the block."""
    p = lambda k: params_ref[off + k]
    a_u, b_u, c_u = p(0), p(1), p(2)              # rectangle u = 2s-1
    a_v, b_v, c_v = p(3), p(4), p(5)              # rectangle v = 2t-1
    a1, b1, c1 = p(6), p(7), p(8)                 # triangle edge fns (orientation-normalized)
    a2, b2, c2 = p(9), p(10), p(11)
    a3, b3, c3 = p(12), p(13), p(14)
    ae, be, ce = p(15), p(16), p(17)              # ellipse x' (radius folded in)
    af, bf, cf = p(18), p(19), p(20)              # ellipse y'
    w_r, w_e, w_t = p(21), p(22), p(23)           # softmax weights * 0.25 (supersample)
    col_r, col_g, col_b = p(24), p(25), p(26)

    # evaluate every affine form once at the first supersample (+0.25, +0.25);
    # the other three samples are pure scalar shifts of these base arrays.
    def base(a, b, c):
        return a * xx + b * yy + (c + 0.25 * (a + b))

    u0 = base(a_u, b_u, c_u)
    v0 = base(a_v, b_v, c_v)
    d10 = base(a1, b1, c1)
    d20 = base(a2, b2, c2)
    d30 = base(a3, b3, c3)
    ex0 = base(ae, be, ce)
    ey0 = base(af, bf, cf)

    cov = jnp.zeros_like(xx)
    for dx, dy in ((0.0, 0.0), (0.5, 0.0), (0.0, 0.5), (0.5, 0.5)):
        def sh(arr, a, b):
            if dx == 0.0 and dy == 0.0:
                return arr
            return arr + (a * dx + b * dy)        # scalar offset, one vector add

        u = sh(u0, a_u, b_u)
        v = sh(v0, a_v, b_v)
        d1 = sh(d10, a1, b1)
        d2 = sh(d20, a2, b2)
        d3 = sh(d30, a3, b3)
        ex = sh(ex0, ae, be)
        ey = sh(ey0, af, bf)

        in_r = jnp.maximum(jnp.abs(u), jnp.abs(v)) <= 1.0
        in_t = jnp.minimum(d1, jnp.minimum(d2, d3)) >= 0.0
        in_e = (ex * ex + ey * ey) <= 1.0

        cov = (cov
               + jnp.where(in_r, w_r, 0.0)
               + jnp.where(in_e, w_e, 0.0)
               + jnp.where(in_t, w_t, 0.0))

    # fill_color = cat(color, [1.0]) -> premultiplied RGBA, alpha = coverage
    out_ref[j, 0, :, :] = col_r * cov
    out_ref[j, 1, :, :] = col_g * cov
    out_ref[j, 2, :, :] = col_b * cov
    out_ref[j, 3, :, :] = cov


# --------------------------------------------------------------------------
# Pallas kernels: flat lane-dense layout, and direct 2-D layout (W % 128 == 0)
# --------------------------------------------------------------------------
def _render_kernel_flat(params_ref, out_ref, *, canvas_w, p_per_step):
    """out_ref: VMEM f32[P, 4, TS, 128]; pixels flattened row-major."""
    g = pl.program_id(0)
    t = pl.program_id(1)
    ts = out_ref.shape[2]
    tile_pix = ts * 128

    row = jax.lax.broadcasted_iota(jnp.int32, (ts, 128), 0)
    col = jax.lax.broadcasted_iota(jnp.int32, (ts, 128), 1)
    idx = (t * tile_pix + row * 128 + col).astype(jnp.float32)
    w_f = float(canvas_w)
    yy = jnp.floor((idx + 0.5) * (1.0 / w_f))
    xx = idx - yy * w_f
    # exact row/col correction (idx is exact in f32 below 2^24 pixels)
    lo = xx < 0.0
    hi = xx >= w_f
    yy = yy + jnp.where(hi, 1.0, 0.0) - jnp.where(lo, 1.0, 0.0)
    xx = xx - jnp.where(hi, w_f, 0.0) + jnp.where(lo, w_f, 0.0)

    base_prim = g * p_per_step
    for j in range(p_per_step):
        off = (base_prim + j) * _PARAMS_PER_PRIM
        _render_one(params_ref, off, xx, yy, out_ref, j)


def _render_kernel_2d(params_ref, out_ref, *, p_per_step):
    """out_ref: VMEM f32[P, 4, TH, W]; direct image layout (W % 128 == 0)."""
    g = pl.program_id(0)
    t = pl.program_id(1)
    th, w = out_ref.shape[2], out_ref.shape[3]

    xx = jax.lax.broadcasted_iota(jnp.int32, (th, w), 1).astype(jnp.float32)
    yy = (jax.lax.broadcasted_iota(jnp.int32, (th, w), 0) + t * th).astype(jnp.float32)

    base_prim = g * p_per_step
    for j in range(p_per_step):
        off = (base_prim + j) * _PARAMS_PER_PRIM
        _render_one(params_ref, off, xx, yy, out_ref, j)


# --------------------------------------------------------------------------
# Wrapper-side scalar precomputation (all per-primitive coefficients)
# --------------------------------------------------------------------------
def _safe_recip(x, eps=1e-12):
    return 1.0 / jnp.where(jnp.abs(x) < eps,
                           jnp.where(x >= 0.0, eps, -eps), x)


def _build_params(type_select, color, rect_pts, ell_affine, tri_pts,
                  canvas_w, canvas_h):
    f32 = jnp.float32
    rect = rect_pts.astype(f32)
    tri = tri_pts.astype(f32)
    aff = ell_affine.astype(f32)
    tsel = type_select.astype(f32)
    col = color.astype(f32)

    # --- rectangle (parallelogram p0,p1,p2,p3=p0+p2-p1):
    #     p = p0 + s*(p1-p0) + t*(p2-p1); inside iff 0<=s,t<=1.
    #     Folded to u=2s-1, v=2t-1 so inside iff max(|u|,|v|) <= 1.
    ax, ay = rect[0, 0], rect[0, 1]
    bx, by = rect[1, 0], rect[1, 1]
    cx, cy = rect[2, 0], rect[2, 1]
    e0x, e0y = bx - ax, by - ay
    e1x, e1y = cx - bx, cy - by
    inv_det = _safe_recip(e0x * e1y - e0y * e1x)
    a_s, b_s = e1y * inv_det, -e1x * inv_det
    c_s = (ay * e1x - ax * e1y) * inv_det
    a_t, b_t = -e0y * inv_det, e0x * inv_det
    c_t = (ax * e0y - ay * e0x) * inv_det
    a_u, b_u, c_u = 2.0 * a_s, 2.0 * b_s, 2.0 * c_s - 1.0
    a_v, b_v, c_v = 2.0 * a_t, 2.0 * b_t, 2.0 * c_t - 1.0

    # --- triangle: orientation-normalized edge functions, inside iff all >= 0
    tax, tay = tri[0, 0], tri[0, 1]
    tbx, tby = tri[1, 0], tri[1, 1]
    tcx, tcy = tri[2, 0], tri[2, 1]
    cross = (tbx - tax) * (tcy - tay) - (tby - tay) * (tcx - tax)
    sgn = jnp.where(cross >= 0.0, 1.0, -1.0).astype(f32)
    a1, b1 = sgn * (tay - tby), sgn * (tbx - tax)
    c1 = sgn * ((tax - tbx) * tby - tbx * (tay - tby))
    a2, b2 = sgn * (tby - tcy), sgn * (tcx - tbx)
    c2 = sgn * ((tbx - tcx) * tcy - tcx * (tby - tcy))
    a3, b3 = sgn * (tcy - tay), sgn * (tax - tcx)
    c3 = sgn * ((tcx - tax) * tay - tax * (tcy - tay))

    # --- ellipse: canvas->shape inverse affine with radii folded in;
    #     inside iff ex^2 + ey^2 <= 1
    lin00, lin01 = aff[0, 0], aff[0, 1]
    lin10, lin11 = aff[1, 0], aff[1, 1]
    tx = aff[0, 2] * canvas_w
    ty = aff[1, 2] * canvas_h
    inv_ldet = _safe_recip(lin00 * lin11 - lin01 * lin10)
    i00, i01 = lin11 * inv_ldet, -lin01 * inv_ldet
    i10, i11 = -lin10 * inv_ldet, lin00 * inv_ldet
    it0 = -(i00 * tx + i01 * ty)
    it1 = -(i10 * tx + i11 * ty)
    inv_rx = 1.0 / (0.5 * canvas_w)
    inv_ry = 1.0 / (0.5 * canvas_h)
    ae, be, ce = i00 * inv_rx, i01 * inv_rx, it0 * inv_rx
    af, bf, cf = i10 * inv_ry, i11 * inv_ry, it1 * inv_ry

    # --- floats_to_blending: softmax(f2b_mat @ type_select); fold the 2x2
    #     supersample weight 1/4 into the blend weights (scalars only).
    z = jnp.stack([_INV_SQRT3 * tsel[0] + tsel[1],
                   _INV_SQRT3 * tsel[0] - tsel[1],
                   -2.0 * _INV_SQRT3 * tsel[0]])
    w = jax.nn.softmax(z) * 0.25

    return jnp.stack([a_u, b_u, c_u, a_v, b_v, c_v,
                      a1, b1, c1, a2, b2, c2, a3, b3, c3,
                      ae, be, ce, af, bf, cf,
                      w[0], w[1], w[2],
                      col[0], col[1], col[2]]).astype(f32)


# --------------------------------------------------------------------------
# Tile / VMEM sizing helpers (generation-aware)
# --------------------------------------------------------------------------
def _vmem_limit_bytes():
    try:
        info = pltpu.get_tpu_info()
        cap = getattr(info, "vmem_capacity_bytes", None)
        if cap:
            # v5e/v6e (128 MiB) -> 64 MiB limit; v7x (64 MiB) -> 32 MiB limit
            return int(min(cap // 2, 64 * 1024 * 1024))
    except Exception:
        pass
    return 32 * 1024 * 1024


def _max_tile_pixels(vmem_limit, p):
    # double-buffered output block (p*4 f32 per pixel) + ~24 f32 planar temps
    per_pixel = 2 * p * 4 * 4 + 96
    pix = int(vmem_limit * 0.6) // per_pixel
    return max(1024, (pix // 1024) * 1024)


def _pick_flat_tile(total, max_pix):
    total_pad = ((total + 1023) // 1024) * 1024
    tile = min(total_pad, max_pix)               # both multiples of 1024
    n_tiles = (total_pad + tile - 1) // tile     # render padded tail, drop later
    return tile, n_tiles


def _pick_th(canvas_h, canvas_w, max_pix):
    if canvas_h * canvas_w <= max_pix:
        return canvas_h
    th = max(8, ((max_pix // canvas_w) // 8) * 8)
    while canvas_h % th:
        th -= 8
    return th


# --------------------------------------------------------------------------
# pallas_call driver (batched over primitives, tiled over pixels)
# --------------------------------------------------------------------------
def _render_nchw(params, *, canvas_w, canvas_h):
    """params: f32[N, 27] -> premultiplied RGBA images, f32[N, 4, H, W]."""
    n = params.shape[0]
    p = min(n, _MAX_PRIMS_PER_STEP)
    n_groups = (n + p - 1) // p
    n_pad = n_groups * p
    if n_pad > n:
        params = jnp.concatenate(
            [params, jnp.zeros((n_pad - n, _PARAMS_PER_PRIM), params.dtype)], axis=0)
    params_flat = params.reshape(-1)             # 1D SMEM: no [*,128]-word padding

    vmem_limit = _vmem_limit_bytes()
    max_pix = _max_tile_pixels(vmem_limit, p)
    total = canvas_w * canvas_h
    cparams = pltpu.CompilerParams(
        dimension_semantics=("parallel", "parallel"),
        vmem_limit_bytes=vmem_limit)

    use_2d = (canvas_w % 128 == 0) and (total <= max_pix or canvas_h % 8 == 0)

    if use_2d:
        th = _pick_th(canvas_h, canvas_w, max_pix)
        n_tiles = canvas_h // th
        cost = pl.CostEstimate(flops=n_pad * total * 160, transcendentals=0,
                               bytes_accessed=n_pad * 4 * total * 4
                               + params_flat.size * 4)
        out = pl.pallas_call(
            functools.partial(_render_kernel_2d, p_per_step=p),
            out_shape=jax.ShapeDtypeStruct((n_pad, 4, canvas_h, canvas_w),
                                           jnp.float32),
            grid=(n_groups, n_tiles),
            in_specs=[pl.BlockSpec(memory_space=pltpu.MemorySpace.SMEM)],
            out_specs=pl.BlockSpec((p, 4, th, canvas_w),
                                   lambda g, t: (g, 0, t, 0)),
            compiler_params=cparams,
            cost_estimate=cost,
        )(params_flat)
        return out[:n]

    # fallback: lane-dense flat pixel layout (full-lane stores for any W)
    tile_pix, n_tiles = _pick_flat_tile(total, max_pix)
    ts = tile_pix // 128                         # multiple of 8
    hw128 = n_tiles * ts
    total_store = hw128 * 128
    cost = pl.CostEstimate(flops=n_pad * total_store * 160, transcendentals=0,
                           bytes_accessed=n_pad * 4 * total_store * 4
                           + params_flat.size * 4)
    out = pl.pallas_call(
        functools.partial(_render_kernel_flat, canvas_w=canvas_w, p_per_step=p),
        out_shape=jax.ShapeDtypeStruct((n_pad, 4, hw128, 128), jnp.float32),
        grid=(n_groups, n_tiles),
        in_specs=[pl.BlockSpec(memory_space=pltpu.MemorySpace.SMEM)],
        out_specs=pl.BlockSpec((p, 4, ts, 128), lambda g, t: (g, 0, t, 0)),
        compiler_params=cparams,
        cost_estimate=cost,
    )(params_flat)

    flat = out[:n].reshape(n, 4, total_store)[:, :, :total]
    return flat.reshape(n, 4, canvas_h, canvas_w)


# --------------------------------------------------------------------------
# Public wrappers (forward-pass semantics of primitive.forward)
# --------------------------------------------------------------------------
def make_primitive_params(obb, canvas_w, canvas_h):
    """Replicates primitive.__init__ parameter derivation from the OBB."""
    obb = jnp.asarray(obb, jnp.float32)
    rectangle_points = obb[0:3]                                  # (3, 2)

    edge0 = obb[1] - obb[0]
    edge1 = obb[2] - obb[1]
    center = (obb[0] + obb[2]) / 2.0
    trans_mat = jnp.stack([edge0, edge1], axis=1) @ jnp.array(
        [[1.0 / canvas_w, 0.0], [0.0, -1.0 / canvas_h]], jnp.float32)
    translate = jnp.array([center[0] / canvas_w, center[1] / canvas_h],
                          jnp.float32).reshape(2, 1)
    ellipse_affine = jnp.concatenate([trans_mat, translate], axis=1)  # (2, 3)

    tri0 = obb[0]
    tri1 = 0.5 * (obb[1] + obb[2])
    tri2 = 0.5 * (obb[2] + obb[3])
    triangle_points = jnp.stack([tri0, tri1, tri2], axis=0)      # (3, 2)
    return rectangle_points, ellipse_affine, triangle_points


@functools.partial(jax.jit, static_argnames=("canvas_w", "canvas_h"))
def primitive_forward(type_select, color, rectangle_points, ellipse_affine,
                      triangle_points, *, canvas_w, canvas_h):
    """Equivalent of primitive.forward(); returns (H, W, 4) RGBA image."""
    params = _build_params(type_select, color, rectangle_points,
                           ellipse_affine, triangle_points,
                           canvas_w, canvas_h)[None]             # (1, 27)
    chw = _render_nchw(params, canvas_w=canvas_w, canvas_h=canvas_h)[0]
    # pydiffvg HWC RGBA convention; use primitive_forward_batch for CHW output.
    return jnp.transpose(chw, (1, 2, 0))


@functools.partial(jax.jit, static_argnames=("canvas_w", "canvas_h"))
def primitive_forward_batch(type_select, color, rectangle_points,
                            ellipse_affine, triangle_points, *,
                            canvas_w, canvas_h):
    """Many primitives in ONE gridded pallas_call; returns (N, 4, H, W) CHW
    (downstream compositing can stay CHW; skips the minor-dim-4 HWC relayout)."""
    build = lambda ts_, c_, r_, e_, t_: _build_params(
        ts_, c_, r_, e_, t_, canvas_w, canvas_h)
    params = jax.vmap(build)(type_select, color, rectangle_points,
                             ellipse_affine, triangle_points)    # (N, 27)
    return _render_nchw(params, canvas_w=canvas_w, canvas_h=canvas_h)


if __name__ == "__main__":
    key = jax.random.PRNGKey(0)
    kc, kt, ko, kb = jax.random.split(key, 4)

    # deterministic small "parameters" of the primitive module
    color = jax.random.uniform(kc, (3,), jnp.float32)            # color_init
    type_select = jax.random.normal(kt, (2,), jnp.float32)       # type_select

    # ---- single-primitive forward at 32x32 (flat lane-dense path) ----
    CANVAS_W, CANVAS_H = 32, 32
    obb = jnp.array([[6.0, 4.0], [26.0, 8.0], [24.0, 28.0], [4.0, 24.0]],
                    jnp.float32) + 0.5 * jax.random.normal(ko, (4, 2), jnp.float32)
    rect_pts, ell_aff, tri_pts = make_primitive_params(obb, CANVAS_W, CANVAS_H)

    img = primitive_forward(type_select, color, rect_pts, ell_aff, tri_pts,
                            canvas_w=CANVAS_W, canvas_h=CANVAS_H)
    jax.block_until_ready(img)
    assert img.shape == (CANVAS_H, CANVAS_W, 4)
    assert bool(jnp.all(jnp.isfinite(img)))
    alpha = img[..., 3]
    assert float(alpha.min()) >= -1e-6 and float(alpha.max()) <= 1.0 + 1e-5
    assert float(alpha.max()) > 0.0

    # ---- batched path: several primitives, one gridded pallas_call ----
    N = 4
    obbs = obb[None] + 0.5 * jax.random.normal(kb, (N, 4, 2), jnp.float32)
    per = [make_primitive_params(o, CANVAS_W, CANVAS_H) for o in obbs]
    rects = jnp.stack([p[0] for p in per])
    ells = jnp.stack([p[1] for p in per])
    tris = jnp.stack([p[2] for p in per])
    colors = jnp.tile(color[None], (N, 1))
    tsels = jnp.tile(type_select[None], (N, 1))

    imgs = primitive_forward_batch(tsels, colors, rects, ells, tris,
                                   canvas_w=CANVAS_W, canvas_h=CANVAS_H)
    jax.block_until_ready(imgs)
    assert imgs.shape == (N, 4, CANVAS_H, CANVAS_W)
    assert bool(jnp.all(jnp.isfinite(imgs)))

    # ---- 2-D direct-layout path: canvas width multiple of 128 ----
    CW2, CH2 = 128, 64
    obb2 = jnp.array([[20.0, 10.0], [100.0, 14.0], [96.0, 54.0], [16.0, 50.0]],
                     jnp.float32)
    per2 = [make_primitive_params(obb2 + 2.0 * i, CW2, CH2) for i in range(3)]
    rects2 = jnp.stack([p[0] for p in per2])
    ells2 = jnp.stack([p[1] for p in per2])
    tris2 = jnp.stack([p[2] for p in per2])
    colors2 = jnp.tile(color[None], (3, 1))
    tsels2 = jnp.tile(type_select[None], (3, 1))

    imgs2 = primitive_forward_batch(tsels2, colors2, rects2, ells2, tris2,
                                    canvas_w=CW2, canvas_h=CH2)
    jax.block_until_ready(imgs2)
    assert imgs2.shape == (3, 4, CH2, CW2)
    assert bool(jnp.all(jnp.isfinite(imgs2)))
    a2 = imgs2[:, 3]
    assert float(a2.min()) >= -1e-6 and float(a2.max()) <= 1.0 + 1e-5
    assert float(a2.max()) > 0.0

    print("KERNEL_OK")
</pallas_src>

<mosaic_0001>
module attributes {stable_mosaic.version = 11 : i64} {
  func.func @_render_kernel_flat(%arg0: i32, %arg1: i32, %arg2: memref<27xf32, #tpu.memory_space<smem>>, %arg3: memref<1x4x8x128xf32, #tpu.memory_space<vmem>>) attributes {dimension_semantics = [#tpu.dimension_semantics<parallel>, #tpu.dimension_semantics<parallel>], iteration_bounds = array<i64: 1, 1>, scalar_prefetch = 0 : i64, scratch_operands = 0 : i64, tpu.core_type = #tpu.core_type<tc>, window_params = [{transform_indices = @transform_0, window_bounds = array<i64: 27>}, {transform_indices = @transform_1, window_bounds = array<i64: 1, 4, 8, 128>}]} {
    %0 = tpu.iota {dimensions = array<i32: 0>} : vector<8x128xi32>
    %1 = tpu.iota {dimensions = array<i32: 1>} : vector<8x128xi32>
    %c1024_i32 = arith.constant 1024 : i32
    %2 = arith.muli %arg1, %c1024_i32 : i32
    %c128_i32 = arith.constant 128 : i32
    %3 = vector.broadcast %c128_i32 : i32 to vector<8x128xi32>
    %4 = arith.muli %0, %3 : vector<8x128xi32>
    %5 = vector.broadcast %2 : i32 to vector<8x128xi32>
    %6 = arith.addi %5, %4 : vector<8x128xi32>
    %7 = arith.addi %6, %1 : vector<8x128xi32>
    %8 = arith.sitofp %7 : vector<8x128xi32> to vector<8x128xf32>
    %cst = arith.constant 5.000000e-01 : f32
    %9 = vector.broadcast %cst : f32 to vector<8x128xf32>
    %10 = arith.addf %8, %9 : vector<8x128xf32>
    %cst_0 = arith.constant 3.125000e-02 : f32
    %11 = vector.broadcast %cst_0 : f32 to vector<8x128xf32>
    %12 = arith.mulf %10, %11 : vector<8x128xf32>
    %13 = math.floor %12 : vector<8x128xf32>
    %cst_1 = arith.constant 3.200000e+01 : f32
    %14 = vector.broadcast %cst_1 : f32 to vector<8x128xf32>
    %15 = arith.mulf %13, %14 : vector<8x128xf32>
    %16 = arith.subf %8, %15 : vector<8x128xf32>
    %cst_2 = arith.constant 0.000000e+00 : f32
    %17 = vector.broadcast %cst_2 : f32 to vector<8x128xf32>
    %18 = arith.cmpf olt, %16, %17 : vector<8x128xf32>
    %cst_3 = arith.constant 3.200000e+01 : f32
    %19 = vector.broadcast %cst_3 : f32 to vector<8x128xf32>
    %20 = arith.cmpf oge, %16, %19 : vector<8x128xf32>
    %cst_4 = arith.constant 1.000000e+00 : f32
    %cst_5 = arith.constant 0.000000e+00 : f32
    %21 = vector.broadcast %cst_4 : f32 to vector<8x128xf32>
    %22 = vector.broadcast %cst_5 : f32 to vector<8x128xf32>
    %23 = arith.select %20, %21, %22 : vector<8x128xi1>, vector<8x128xf32>
    %24 = arith.addf %13, %23 : vector<8x128xf32>
    %cst_6 = arith.constant 1.000000e+00 : f32
    %cst_7 = arith.constant 0.000000e+00 : f32
    %25 = vector.broadcast %cst_6 : f32 to vector<8x128xf32>
    %26 = vector.broadcast %cst_7 : f32 to vector<8x128xf32>
    %27 = arith.select %18, %25, %26 : vector<8x128xi1>, vector<8x128xf32>
    %28 = arith.subf %24, %27 : vector<8x128xf32>
    %cst_8 = arith.constant 3.200000e+01 : f32
    %cst_9 = arith.constant 0.000000e+00 : f32
    %29 = vector.broadcast %cst_8 : f32 to vector<8x128xf32>
    %30 = vector.broadcast %cst_9 : f32 to vector<8x128xf32>
    %31 = arith.select %20, %29, %30 : vector<8x128xi1>, vector<8x128xf32>
    %32 = arith.subf %16, %31 : vector<8x128xf32>
    %cst_10 = arith.constant 3.200000e+01 : f32
    %cst_11 = arith.constant 0.000000e+00 : f32
    %33 = vector.broadcast %cst_10 : f32 to vector<8x128xf32>
    %34 = vector.broadcast %cst_11 : f32 to vector<8x128xf32>
    %35 = arith.select %18, %33, %34 : vector<8x128xi1>, vector<8x128xf32>
    %36 = arith.addf %32, %35 : vector<8x128xf32>
    %c1_i32 = arith.constant 1 : i32
    %37 = arith.muli %arg0, %c1_i32 : i32
    %c0_i32 = arith.constant 0 : i32
    %38 = arith.addi %37, %c0_i32 : i32
    %c27_i32 = arith.constant 27 : i32
    %39 = arith.muli %38, %c27_i32 : i32
    %c0_i32_12 = arith.constant 0 : i32
    %40 = arith.addi %39, %c0_i32_12 : i32
    %41 = arith.index_cast %40 : i32 to index
    %42 = memref.load %arg2[%41] : memref<27xf32, #tpu.memory_space<smem>>
    %c1_i32_13 = arith.constant 1 : i32
    %43 = arith.addi %39, %c1_i32_13 : i32
    %44 = arith.index_cast %43 : i32 to index
    %45 = memref.load %arg2[%44] : memref<27xf32, #tpu.memory_space<smem>>
    %c2_i32 = arith.constant 2 : i32
    %46 = arith.addi %39, %c2_i32 : i32
    %47 = arith.index_cast %46 : i32 to index
    %48 = memref.load %arg2[%47] : memref<27xf32, #tpu.memory_space<smem>>
    %c3_i32 = arith.constant 3 : i32
    %49 = arith.addi %39, %c3_i32 : i32
    %50 = arith.index_cast %49 : i32 to index
    %51 = memref.load %arg2[%50] : memref<27xf32, #tpu.memory_space<smem>>
    %c4_i32 = arith.constant 4 : i32
    %52 = arith.addi %39, %c4_i32 : i32
    %53 = arith.index_cast %52 : i32 to index
    %54 = memref.load %arg2[%53] : memref<27xf32, #tpu.memory_space<smem>>
    %c5_i32 = arith.constant 5 : i32
    %55 = arith.addi %39, %c5_i32 : i32
    %56 = arith.index_cast %55 : i32 to index
    %57 = memref.load %arg2[%56] : memref<27xf32, #tpu.memory_space<smem>>
    %c6_i32 = arith.constant 6 : i32
    %58 = arith.addi %39, %c6_i32 : i32
    %59 = arith.index_cast %58 : i32 to index
    %60 = memref.load %arg2[%59] : memref<27xf32, #tpu.memory_space<smem>>
    %c7_i32 = arith.constant 7 : i32
    %61 = arith.addi %39, %c7_i32 : i32
    %62 = arith.index_cast %61 : i32 to index
    %63 = memref.load %arg2[%62] : memref<27xf32, #tpu.memory_space<smem>>
    %c8_i32 = arith.constant 8 : i32
    %64 = arith.addi %39, %c8_i32 : i32
    %65 = arith.index_cast %64 : i32 to index
    %66 = memref.load %arg2[%65] : memref<27xf32, #tpu.memory_space<smem>>
    %c9_i32 = arith.constant 9 : i32
    %67 = arith.addi %39, %c9_i32 : i32
    %68 = arith.index_cast %67 : i32 to index
    %69 = memref.load %arg2[%68] : memref<27xf32, #tpu.memory_space<smem>>
    %c10_i32 = arith.constant 10 : i32
    %70 = arith.addi %39, %c10_i32 : i32
    %71 = arith.index_cast %70 : i32 to index
    %72 = memref.load %arg2[%71] : memref<27xf32, #tpu.memory_space<smem>>
    %c11_i32 = arith.constant 11 : i32
    %73 = arith.addi %39, %c11_i32 : i32
    %74 = arith.index_cast %73 : i32 to index
    %75 = memref.load %arg2[%74] : memref<27xf32, #tpu.memory_space<smem>>
    %c12_i32 = arith.constant 12 : i32
    %76 = arith.addi %39, %c12_i32 : i32
    %77 = arith.index_cast %76 : i32 to index
    %78 = memref.load %arg2[%77] : memref<27xf32, #tpu.memory_space<smem>>
    %c13_i32 = arith.constant 13 : i32
    %79 = arith.addi %39, %c13_i32 : i32
    %80 = arith.index_cast %79 : i32 to index
    %81 = memref.load %arg2[%80] : memref<27xf32, #tpu.memory_space<smem>>
    %c14_i32 = arith.constant 14 : i32
    %82 = arith.addi %39, %c14_i32 : i32
    %83 = arith.index_cast %82 : i32 to index
    %84 = memref.load %arg2[%83] : memref<27xf32, #tpu.memory_space<smem>>
    %c15_i32 = arith.constant 15 : i32
    %85 = arith.addi %39, %c15_i32 : i32
    %86 = arith.index_cast %85 : i32 to index
    %87 = memref.load %arg2[%86] : memref<27xf32, #tpu.memory_space<smem>>
    %c16_i32 = arith.constant 16 : i32
    %88 = arith.addi %39, %c16_i32 : i32
    %89 = arith.index_cast %88 : i32 to index
    %90 = memref.load %arg2[%89] : memref<27xf32, #tpu.memory_space<smem>>
    %c17_i32 = arith.constant 17 : i32
    %91 = arith.addi %39, %c17_i32 : i32
    %92 = arith.index_cast %91 : i32 to index
    %93 = memref.load %arg2[%92] : memref<27xf32, #tpu.memory_space<smem>>
    %c18_i32 = arith.constant 18 : i32
    %94 = arith.addi %39, %c18_i32 : i32
    %95 = arith.index_cast %94 : i32 to index
    %96 = memref.load %arg2[%95] : memref<27xf32, #tpu.memory_space<smem>>
    %c19_i32 = arith.constant 19 : i32
    %97 = arith.addi %39, %c19_i32 : i32
    %98 = arith.index_cast %97 : i32 to index
    %99 = memref.load %arg2[%98] : memref<27xf32, #tpu.memory_space<smem>>
    %c20_i32 = arith.constant 20 : i32
    %100 = arith.addi %39, %c20_i32 : i32
    %101 = arith.index_cast %100 : i32 to index
    %102 = memref.load %arg2[%101] : memref<27xf32, #tpu.memory_space<smem>>
    %c21_i32 = arith.constant 21 : i32
    %103 = arith.addi %39, %c21_i32 : i32
    %104 = arith.index_cast %103 : i32 to index
    %105 = memref.load %arg2[%104] : memref<27xf32, #tpu.memory_space<smem>>
    %c22_i32 = arith.constant 22 : i32
    %106 = arith.addi %39, %c22_i32 : i32
    %107 = arith.index_cast %106 : i32 to index
    %108 = memref.load %arg2[%107] : memref<27xf32, #tpu.memory_space<smem>>
    %c23_i32 = arith.constant 23 : i32
    %109 = arith.addi %39, %c23_i32 : i32
    %110 = arith.index_cast %109 : i32 to index
    %111 = memref.load %arg2[%110] : memref<27xf32, #tpu.memory_space<smem>>
    %c24_i32 = arith.constant 24 : i32
    %112 = arith.addi %39, %c24_i32 : i32
    %113 = arith.index_cast %112 : i32 to index
    %114 = memref.load %arg2[%113] : memref<27xf32, #tpu.memory_space<smem>>
    %c25_i32 = arith.constant 25 : i32
    %115 = arith.addi %39, %c25_i32 : i32
    %116 = arith.index_cast %115 : i32 to index
    %117 = memref.load %arg2[%116] : memref<27xf32, #tpu.memory_space<smem>>
    %c26_i32 = arith.constant 26 : i32
    %118 = arith.addi %39, %c26_i32 : i32
    %119 = arith.index_cast %118 : i32 to index
    %120 = memref.load %arg2[%119] : memref<27xf32, #tpu.memory_space<smem>>
    %121 = vector.broadcast %42 : f32 to vector<8x128xf32>
    %122 = arith.mulf %121, %36 : vector<8x128xf32>
    %123 = vector.broadcast %45 : f32 to vector<8x128xf32>
    %124 = arith.mulf %123, %28 : vector<8x128xf32>
    %125 = arith.addf %122, %124 : vector<8x128xf32>
    %126 = arith.addf %42, %45 : f32
    %cst_14 = arith.constant 2.500000e-01 : f32
    %127 = arith.mulf %cst_14, %126 : f32
    %128 = arith.addf %48, %127 : f32
    %129 = vector.broadcast %128 : f32 to vector<8x128xf32>
    %130 = arith.addf %125, %129 : vector<8x128xf32>
    %131 = vector.broadcast %51 : f32 to vector<8x128xf32>
    %132 = arith.mulf %131, %36 : vector<8x128xf32>
    %133 = vector.broadcast %54 : f32 to vector<8x128xf32>
    %134 = arith.mulf %133, %28 : vector<8x128xf32>
    %135 = arith.addf %132, %134 : vector<8x128xf32>
    %136 = arith.addf %51, %54 : f32
    %cst_15 = arith.constant 2.500000e-01 : f32
    %137 = arith.mulf %cst_15, %136 : f32
    %138 = arith.addf %57, %137 : f32
    %139 = vector.broadcast %138 : f32 to vector<8x128xf32>
    %140 = arith.addf %135, %139 : vector<8x128xf32>
    %141 = vector.broadcast %60 : f32 to vector<8x128xf32>
    %142 = arith.mulf %141, %36 : vector<8x128xf32>
    %143 = vector.broadcast %63 : f32 to vector<8x128xf32>
    %144 = arith.mulf %143, %28 : vector<8x128xf32>
    %145 = arith.addf %142, %144 : vector<8x128xf32>
    %146 = arith.addf %60, %63 : f32
    %cst_16 = arith.constant 2.500000e-01 : f32
    %147 = arith.mulf %cst_16, %146 : f32
    %148 = arith.addf %66, %147 : f32
    %149 = vector.broadcast %148 : f32 to vector<8x128xf32>
    %150 = arith.addf %145, %149 : vector<8x128xf32>
    %151 = vector.broadcast %69 : f32 to vector<8x128xf32>
    %152 = arith.mulf %151, %36 : vector<8x128xf32>
    %153 = vector.broadcast %72 : f32 to vector<8x128xf32>
    %154 = arith.mulf %153, %28 : vector<8x128xf32>
    %155 = arith.addf %152, %154 : vector<8x128xf32>
    %156 = arith.addf %69, %72 : f32
    %cst_17 = arith.constant 2.500000e-01 : f32
    %157 = arith.mulf %cst_17, %156 : f32
    %158 = arith.addf %75, %157 : f32
    %159 = vector.broadcast %158 : f32 to vector<8x128xf32>
    %160 = arith.addf %155, %159 : vector<8x128xf32>
    %161 = vector.broadcast %78 : f32 to vector<8x128xf32>
    %162 = arith.mulf %161, %36 : vector<8x128xf32>
    %163 = vector.broadcast %81 : f32 to vector<8x128xf32>
    %164 = arith.mulf %163, %28 : vector<8x128xf32>
    %165 = arith.addf %162, %164 : vector<8x128xf32>
    %166 = arith.addf %78, %81 : f32
    %cst_18 = arith.constant 2.500000e-01 : f32
    %167 = arith.mulf %cst_18, %166 : f32
    %168 = arith.addf %84, %167 : f32
    %169 = vector.broadcast %168 : f32 to vector<8x128xf32>
    %170 = arith.addf %165, %169 : vector<8x128xf32>
    %171 = vector.broadcast %87 : f32 to vector<8x128xf32>
    %172 = arith.mulf %171, %36 : vector<8x128xf32>
    %173 = vector.broadcast %90 : f32 to vector<8x128xf32>
    %174 = arith.mulf %173, %28 : vector<8x128xf32>
    %175 = arith.addf %172, %174 : vector<8x128xf32>
    %176 = arith.addf %87, %90 : f32
    %cst_19 = arith.constant 2.500000e-01 : f32
    %177 = arith.mulf %cst_19, %176 : f32
    %178 = arith.addf %93, %177 : f32
    %179 = vector.broadcast %178 : f32 to vector<8x128xf32>
    %180 = arith.addf %175, %179 : vector<8x128xf32>
    %181 = vector.broadcast %96 : f32 to vector<8x128xf32>
    %182 = arith.mulf %181, %36 : vector<8x128xf32>
    %183 = vector.broadcast %99 : f32 to vector<8x128xf32>
    %184 = arith.mulf %183, %28 : vector<8x128xf32>
    %185 = arith.addf %182, %184 : vector<8x128xf32>
    %186 = arith.addf %96, %99 : f32
    %cst_20 = arith.constant 2.500000e-01 : f32
    %187 = arith.mulf %cst_20, %186 : f32
    %188 = arith.addf %102, %187 : f32
    %189 = vector.broadcast %188 : f32 to vector<8x128xf32>
    %190 = arith.addf %185, %189 : vector<8x128xf32>
    %cst_21 = arith.constant 0.000000e+00 : f32
    %191 = vector.broadcast %cst_21 : f32 to vector<8x128xf32>
    %192 = math.absf %130 : vector<8x128xf32>
    %193 = math.absf %140 : vector<8x128xf32>
    %194 = arith.maximumf %192, %193 : vector<8x128xf32>
    %cst_22 = arith.constant 1.000000e+00 : f32
    %195 = vector.broadcast %cst_22 : f32 to vector<8x128xf32>
    %196 = arith.cmpf ole, %194, %195 : vector<8x128xf32>
    %197 = arith.minimumf %160, %170 : vector<8x128xf32>
    %198 = arith.minimumf %150, %197 : vector<8x128xf32>
    %cst_23 = arith.constant 0.000000e+00 : f32
    %199 = vector.broadcast %cst_23 : f32 to vector<8x128xf32>
    %200 = arith.cmpf oge, %198, %199 : vector<8x128xf32>
    %201 = arith.mulf %180, %180 : vector<8x128xf32>
    %202 = arith.mulf %190, %190 : vector<8x128xf32>
    %203 = arith.addf %201, %202 : vector<8x128xf32>
    %cst_24 = arith.constant 1.000000e+00 : f32
    %204 = vector.broadcast %cst_24 : f32 to vector<8x128xf32>
    %205 = arith.cmpf ole, %203, %204 : vector<8x128xf32>
    %cst_25 = arith.constant 0.000000e+00 : f32
    %206 = vector.broadcast %105 : f32 to vector<8x128xf32>
    %207 = vector.broadcast %cst_25 : f32 to vector<8x128xf32>
    %208 = arith.select %196, %206, %207 : vector<8x128xi1>, vector<8x128xf32>
    %209 = arith.addf %191, %208 : vector<8x128xf32>
    %cst_26 = arith.constant 0.000000e+00 : f32
    %210 = vector.broadcast %108 : f32 to vector<8x128xf32>
    %211 = vector.broadcast %cst_26 : f32 to vector<8x128xf32>
    %212 = arith.select %205, %210, %211 : vector<8x128xi1>, vector<8x128xf32>
    %213 = arith.addf %209, %212 : vector<8x128xf32>
    %cst_27 = arith.constant 0.000000e+00 : f32
    %214 = vector.broadcast %111 : f32 to vector<8x128xf32>
    %215 = vector.broadcast %cst_27 : f32 to vector<8x128xf32>
    %216 = arith.select %200, %214, %215 : vector<8x128xi1>, vector<8x128xf32>
    %217 = arith.addf %213, %216 : vector<8x128xf32>
    %cst_28 = arith.constant 5.000000e-01 : f32
    %218 = arith.mulf %42, %cst_28 : f32
    %cst_29 = arith.constant 0.000000e+00 : f32
    %219 = arith.mulf %45, %cst_29 : f32
    %220 = arith.addf %218, %219 : f32
    %221 = vector.broadcast %220 : f32 to vector<8x128xf32>
    %222 = arith.addf %130, %221 : vector<8x128xf32>
    %cst_30 = arith.constant 5.000000e-01 : f32
    %223 = arith.mulf %51, %cst_30 : f32
    %cst_31 = arith.constant 0.000000e+00 : f32
    %224 = arith.mulf %54, %cst_31 : f32
    %225 = arith.addf %223, %224 : f32
    %226 = vector.broadcast %225 : f32 to vector<8x128xf32>
    %227 = arith.addf %140, %226 : vector<8x128xf32>
    %cst_32 = arith.constant 5.000000e-01 : f32
    %228 = arith.mulf %60, %cst_32 : f32
    %cst_33 = arith.constant 0.000000e+00 : f32
    %229 = arith.mulf %63, %cst_33 : f32
    %230 = arith.addf %228, %229 : f32
    %231 = vector.broadcast %230 : f32 to vector<8x128xf32>
    %232 = arith.addf %150, %231 : vector<8x128xf32>
    %cst_34 = arith.constant 5.000000e-01 : f32
    %233 = arith.mulf %69, %cst_34 : f32
    %cst_35 = arith.constant 0.000000e+00 : f32
    %234 = arith.mulf %72, %cst_35 : f32
    %235 = arith.addf %233, %234 : f32
    %236 = vector.broadcast %235 : f32 to vector<8x128xf32>
    %237 = arith.addf %160, %236 : vector<8x128xf32>
    %cst_36 = arith.constant 5.000000e-01 : f32
    %238 = arith.mulf %78, %cst_36 : f32
    %cst_37 = arith.constant 0.000000e+00 : f32
    %239 = arith.mulf %81, %cst_37 : f32
    %240 = arith.addf %238, %239 : f32
    %241 = vector.broadcast %240 : f32 to vector<8x128xf32>
    %242 = arith.addf %170, %241 : vector<8x128xf32>
    %cst_38 = arith.constant 5.000000e-01 : f32
    %243 = arith.mulf %87, %cst_38 : f32
    %cst_39 = arith.constant 0.000000e+00 : f32
    %244 = arith.mulf %90, %cst_39 : f32
    %245 = arith.addf %243, %244 : f32
    %246 = vector.broadcast %245 : f32 to vector<8x128xf32>
    %247 = arith.addf %180, %246 : vector<8x128xf32>
    %cst_40 = arith.constant 5.000000e-01 : f32
    %248 = arith.mulf %96, %cst_40 : f32
    %cst_41 = arith.constant 0.000000e+00 : f32
    %249 = arith.mulf %99, %cst_41 : f32
    %250 = arith.addf %248, %249 : f32
    %251 = vector.broadcast %250 : f32 to vector<8x128xf32>
    %252 = arith.addf %190, %251 : vector<8x128xf32>
    %253 = math.absf %222 : vector<8x128xf32>
    %254 = math.absf %227 : vector<8x128xf32>
    %255 = arith.maximumf %253, %254 : vector<8x128xf32>
    %cst_42 = arith.constant 1.000000e+00 : f32
    %256 = vector.broadcast %cst_42 : f32 to vector<8x128xf32>
    %257 = arith.cmpf ole, %255, %256 : vector<8x128xf32>
    %258 = arith.minimumf %237, %242 : vector<8x128xf32>
    %259 = arith.minimumf %232, %258 : vector<8x128xf32>
    %cst_43 = arith.constant 0.000000e+00 : f32
    %260 = vector.broadcast %cst_43 : f32 to vector<8x128xf32>
    %261 = arith.cmpf oge, %259, %260 : vector<8x128xf32>
    %262 = arith.mulf %247, %247 : vector<8x128xf32>
    %263 = arith.mulf %252, %252 : vector<8x128xf32>
    %264 = arith.addf %262, %263 : vector<8x128xf32>
    %cst_44 = arith.constant 1.000000e+00 : f32
    %265 = vector.broadcast %cst_44 : f32 to vector<8x128xf32>
    %266 = arith.cmpf ole, %264, %265 : vector<8x128xf32>
    %cst_45 = arith.constant 0.000000e+00 : f32
    %267 = vector.broadcast %105 : f32 to vector<8x128xf32>
    %268 = vector.broadcast %cst_45 : f32 to vector<8x128xf32>
    %269 = arith.select %257, %267, %268 : vector<8x128xi1>, vector<8x128xf32>
    %270 = arith.addf %217, %269 : vector<8x128xf32>
    %cst_46 = arith.constant 0.000000e+00 : f32
    %271 = vector.broadcast %108 : f32 to vector<8x128xf32>
    %272 = vector.broadcast %cst_46 : f32 to vector<8x128xf32>
    %273 = arith.select %266, %271, %272 : vector<8x128xi1>, vector<8x128xf32>
    %274 = arith.addf %270, %273 : vector<8x128xf32>
    %cst_47 = arith.constant 0.000000e+00 : f32
    %275 = vector.broadcast %111 : f32 to vector<8x128xf32>
    %276 = vector.broadcast %cst_47 : f32 to vector<8x128xf32>
    %277 = arith.select %261, %275, %276 : vector<8x128xi1>, vector<8x128xf32>
    %278 = arith.addf %274, %277 : vector<8x128xf32>
    %cst_48 = arith.constant 0.000000e+00 : f32
    %279 = arith.mulf %42, %cst_48 : f32
    %cst_49 = arith.constant 5.000000e-01 : f32
    %280 = arith.mulf %45, %cst_49 : f32
    %281 = arith.addf %279, %280 : f32
    %282 = vector.broadcast %281 : f32 to vector<8x128xf32>
    %283 = arith.addf %130, %282 : vector<8x128xf32>
    %cst_50 = arith.constant 0.000000e+00 : f32
    %284 = arith.mulf %51, %cst_50 : f32
    %cst_51 = arith.constant 5.000000e-01 : f32
    %285 = arith.mulf %54, %cst_51 : f32
    %286 = arith.addf %284, %285 : f32
    %287 = vector.broadcast %286 : f32 to vector<8x128xf32>
    %288 = arith.addf %140, %287 : vector<8x128xf32>
    %cst_52 = arith.constant 0.000000e+00 : f32
    %289 = arith.mulf %60, %cst_52 : f32
    %cst_53 = arith.constant 5.000000e-01 : f32
    %290 = arith.mulf %63, %cst_53 : f32
    %291 = arith.addf %289, %290 : f32
    %292 = vector.broadcast %291 : f32 to vector<8x128xf32>
    %293 = arith.addf %150, %292 : vector<8x128xf32>
    %cst_54 = arith.constant 0.000000e+00 : f32
    %294 = arith.mulf %69, %cst_54 : f32
    %cst_55 = arith.constant 5.000000e-01 : f32
    %295 = arith.mulf %72, %cst_55 : f32
    %296 = arith.addf %294, %295 : f32
    %297 = vector.broadcast %296 : f32 to vector<8x128xf32>
    %298 = arith.addf %160, %297 : vector<8x128xf32>
    %cst_56 = arith.constant 0.000000e+00 : f32
    %299 = arith.mulf %78, %cst_56 : f32
    %cst_57 = arith.constant 5.000000e-01 : f32
    %300 = arith.mulf %81, %cst_57 : f32
    %301 = arith.addf %299, %300 : f32
    %302 = vector.broadcast %301 : f32 to vector<8x128xf32>
    %303 = arith.addf %170, %302 : vector<8x128xf32>
    %cst_58 = arith.constant 0.000000e+00 : f32
    %304 = arith.mulf %87, %cst_58 : f32
    %cst_59 = arith.constant 5.000000e-01 : f32
    %305 = arith.mulf %90, %cst_59 : f32
    %306 = arith.addf %304, %305 : f32
    %307 = vector.broadcast %306 : f32 to vector<8x128xf32>
    %308 = arith.addf %180, %307 : vector<8x128xf32>
    %cst_60 = arith.constant 0.000000e+00 : f32
    %309 = arith.mulf %96, %cst_60 : f32
    %cst_61 = arith.constant 5.000000e-01 : f32
    %310 = arith.mulf %99, %cst_61 : f32
    %311 = arith.addf %309, %310 : f32
    %312 = vector.broadcast %311 : f32 to vector<8x128xf32>
    %313 = arith.addf %190, %312 : vector<8x128xf32>
    %314 = math.absf %283 : vector<8x128xf32>
    %315 = math.absf %288 : vector<8x128xf32>
    %316 = arith.maximumf %314, %315 : vector<8x128xf32>
    %cst_62 = arith.constant 1.000000e+00 : f32
    %317 = vector.broadcast %cst_62 : f32 to vector<8x128xf32>
    %318 = arith.cmpf ole, %316, %317 : vector<8x128xf32>
    %319 = arith.minimumf %298, %303 : vector<8x128xf32>
    %320 = arith.minimumf %293, %319 : vector<8x128xf32>
    %cst_63 = arith.constant 0.000000e+00 : f32
    %321 = vector.broadcast %cst_63 : f32 to vector<8x128xf32>
    %322 = arith.cmpf oge, %320, %321 : vector<8x128xf32>
    %323 = arith.mulf %308, %308 : vector<8x128xf32>
    %324 = arith.mulf %313, %313 : vector<8x128xf32>
    %325 = arith.addf %323, %324 : vector<8x128xf32>
    %cst_64 = arith.constant 1.000000e+00 : f32
    %326 = vector.broadcast %cst_64 : f32 to vector<8x128xf32>
    %327 = arith.cmpf ole, %325, %326 : vector<8x128xf32>
    %cst_65 = arith.constant 0.000000e+00 : f32
    %328 = vector.broadcast %105 : f32 to vector<8x128xf32>
    %329 = vector.broadcast %cst_65 : f32 to vector<8x128xf32>
    %330 = arith.select %318, %328, %329 : vector<8x128xi1>, vector<8x128xf32>
    %331 = arith.addf %278, %330 : vector<8x128xf32>
    %cst_66 = arith.constant 0.000000e+00 : f32
    %332 = vector.broadcast %108 : f32 to vector<8x128xf32>
    %333 = vector.broadcast %cst_66 : f32 to vector<8x128xf32>
    %334 = arith.select %327, %332, %333 : vector<8x128xi1>, vector<8x128xf32>
    %335 = arith.addf %331, %334 : vector<8x128xf32>
    %cst_67 = arith.constant 0.000000e+00 : f32
    %336 = vector.broadcast %111 : f32 to vector<8x128xf32>
    %337 = vector.broadcast %cst_67 : f32 to vector<8x128xf32>
    %338 = arith.select %322, %336, %337 : vector<8x128xi1>, vector<8x128xf32>
    %339 = arith.addf %335, %338 : vector<8x128xf32>
    %cst_68 = arith.constant 5.000000e-01 : f32
    %340 = arith.mulf %42, %cst_68 : f32
    %cst_69 = arith.constant 5.000000e-01 : f32
    %341 = arith.mulf %45, %cst_69 : f32
    %342 = arith.addf %340, %341 : f32
    %343 = vector.broadcast %342 : f32 to vector<8x128xf32>
    %344 = arith.addf %130, %343 : vector<8x128xf32>
    %cst_70 = arith.constant 5.000000e-01 : f32
    %345 = arith.mulf %51, %cst_70 : f32
    %cst_71 = arith.constant 5.000000e-01 : f32
    %346 = arith.mulf %54, %cst_71 : f32
    %347 = arith.addf %345, %346 : f32
    %348 = vector.broadcast %347 : f32 to vector<8x128xf32>
    %349 = arith.addf %140, %348 : vector<8x128xf32>
    %cst_72 = arith.constant 5.000000e-01 : f32
    %350 = arith.mulf %60, %cst_72 : f32
    %cst_73 = arith.constant 5.000000e-01 : f32
    %351 = arith.mulf %63, %cst_73 : f32
    %352 = arith.addf %350, %351 : f32
    %353 = vector.broadcast %352 : f32 to vector<8x128xf32>
    %354 = arith.addf %150, %353 : vector<8x128xf32>
    %cst_74 = arith.constant 5.000000e-01 : f32
    %355 = arith.mulf %69, %cst_74 : f32
    %cst_75 = arith.constant 5.000000e-01 : f32
    %356 = arith.mulf %72, %cst_75 : f32
    %357 = arith.addf %355, %356 : f32
    %358 = vector.broadcast %357 : f32 to vector<8x128xf32>
    %359 = arith.addf %160, %358 : vector<8x128xf32>
    %cst_76 = arith.constant 5.000000e-01 : f32
    %360 = arith.mulf %78, %cst_76 : f32
    %cst_77 = arith.constant 5.000000e-01 : f32
    %361 = arith.mulf %81, %cst_77 : f32
    %362 = arith.addf %360, %361 : f32
    %363 = vector.broadcast %362 : f32 to vector<8x128xf32>
    %364 = arith.addf %170, %363 : vector<8x128xf32>
    %cst_78 = arith.constant 5.000000e-01 : f32
    %365 = arith.mulf %87, %cst_78 : f32
    %cst_79 = arith.constant 5.000000e-01 : f32
    %366 = arith.mulf %90, %cst_79 : f32
    %367 = arith.addf %365, %366 : f32
    %368 = vector.broadcast %367 : f32 to vector<8x128xf32>
    %369 = arith.addf %180, %368 : vector<8x128xf32>
    %cst_80 = arith.constant 5.000000e-01 : f32
    %370 = arith.mulf %96, %cst_80 : f32
    %cst_81 = arith.constant 5.000000e-01 : f32
    %371 = arith.mulf %99, %cst_81 : f32
    %372 = arith.addf %370, %371 : f32
    %373 = vector.broadcast %372 : f32 to vector<8x128xf32>
    %374 = arith.addf %190, %373 : vector<8x128xf32>
    %375 = math.absf %344 : vector<8x128xf32>
    %376 = math.absf %349 : vector<8x128xf32>
    %377 = arith.maximumf %375, %376 : vector<8x128xf32>
    %cst_82 = arith.constant 1.000000e+00 : f32
    %378 = vector.broadcast %cst_82 : f32 to vector<8x128xf32>
    %379 = arith.cmpf ole, %377, %378 : vector<8x128xf32>
    %380 = arith.minimumf %359, %364 : vector<8x128xf32>
    %381 = arith.minimumf %354, %380 : vector<8x128xf32>
    %cst_83 = arith.constant 0.000000e+00 : f32
    %382 = vector.broadcast %cst_83 : f32 to vector<8x128xf32>
    %383 = arith.cmpf oge, %381, %382 : vector<8x128xf32>
    %384 = arith.mulf %369, %369 : vector<8x128xf32>
    %385 = arith.mulf %374, %374 : vector<8x128xf32>
    %386 = arith.addf %384, %385 : vector<8x128xf32>
    %cst_84 = arith.constant 1.000000e+00 : f32
    %387 = vector.broadcast %cst_84 : f32 to vector<8x128xf32>
    %388 = arith.cmpf ole, %386, %387 : vector<8x128xf32>
    %cst_85 = arith.constant 0.000000e+00 : f32
    %389 = vector.broadcast %105 : f32 to vector<8x128xf32>
    %390 = vector.broadcast %cst_85 : f32 to vector<8x128xf32>
    %391 = arith.select %379, %389, %390 : vector<8x128xi1>, vector<8x128xf32>
    %392 = arith.addf %339, %391 : vector<8x128xf32>
    %cst_86 = arith.constant 0.000000e+00 : f32
    %393 = vector.broadcast %108 : f32 to vector<8x128xf32>
    %394 = vector.broadcast %cst_86 : f32 to vector<8x128xf32>
    %395 = arith.select %388, %393, %394 : vector<8x128xi1>, vector<8x128xf32>
    %396 = arith.addf %392, %395 : vector<8x128xf32>
    %cst_87 = arith.constant 0.000000e+00 : f32
    %397 = vector.broadcast %111 : f32 to vector<8x128xf32>
    %398 = vector.broadcast %cst_87 : f32 to vector<8x128xf32>
    %399 = arith.select %383, %397, %398 : vector<8x128xi1>, vector<8x128xf32>
    %400 = arith.addf %396, %399 : vector<8x128xf32>
    %401 = vector.broadcast %114 : f32 to vector<8x128xf32>
    %402 = arith.mulf %401, %400 : vector<8x128xf32>
    %c0 = arith.constant 0 : index
    %c0_88 = arith.constant 0 : index
    %c0_89 = arith.constant 0 : index
    %c0_90 = arith.constant 0 : index
    %403 = vector.load %arg3[%c0, %c0_88, %c0_89, %c0_90] : memref<1x4x8x128xf32, #tpu.memory_space<vmem>>, vector<1x1x8x128xf32>
    %404 = vector.shape_cast %403 : vector<1x1x8x128xf32> to vector<8x128xf32>
    %405 = vector.shape_cast %402 : vector<8x128xf32> to vector<1x1x8x128xf32>
    tpu.vector_store %arg3[%c0, %c0_88, %c0_89, %c0_90], %405 {strides = array<i32>} : memref<1x4x8x128xf32, #tpu.memory_space<vmem>>, vector<1x1x8x128xf32>,
    %406 = vector.broadcast %117 : f32 to vector<8x128xf32>
    %407 = arith.mulf %406, %400 : vector<8x128xf32>
    %c0_91 = arith.constant 0 : index
    %c1 = arith.constant 1 : index
    %c0_92 = arith.constant 0 : index
    %c0_93 = arith.constant 0 : index
    %408 = vector.load %arg3[%c0_91, %c1, %c0_92, %c0_93] : memref<1x4x8x128xf32, #tpu.memory_space<vmem>>, vector<1x1x8x128xf32>
    %409 = vector.shape_cast %408 : vector<1x1x8x128xf32> to vector<8x128xf32>
    %410 = vector.shape_cast %407 : vector<8x128xf32> to vector<1x1x8x128xf32>
    tpu.vector_store %arg3[%c0_91, %c1, %c0_92, %c0_93], %410 {strides = array<i32>} : memref<1x4x8x128xf32, #tpu.memory_space<vmem>>, vector<1x1x8x128xf32>,
    %411 = vector.broadcast %120 : f32 to vector<8x128xf32>
    %412 = arith.mulf %411, %400 : vector<8x128xf32>
    %c0_94 = arith.constant 0 : index
    %c2 = arith.constant 2 : index
    %c0_95 = arith.constant 0 : index
    %c0_96 = arith.constant 0 : index
    %413 = vector.load %arg3[%c0_94, %c2, %c0_95, %c0_96] : memref<1x4x8x128xf32, #tpu.memory_space<vmem>>, vector<1x1x8x128xf32>
    %414 = vector.shape_cast %413 : vector<1x1x8x128xf32> to vector<8x128xf32>
    %415 = vector.shape_cast %412 : vector<8x128xf32> to vector<1x1x8x128xf32>
    tpu.vector_store %arg3[%c0_94, %c2, %c0_95, %c0_96], %415 {strides = array<i32>} : memref<1x4x8x128xf32, #tpu.memory_space<vmem>>, vector<1x1x8x128xf32>,
    %c0_97 = arith.constant 0 : index
    %c3 = arith.constant 3 : index
    %c0_98 = arith.constant 0 : index
    %c0_99 = arith.constant 0 : index
    %416 = vector.load %arg3[%c0_97, %c3, %c0_98, %c0_99] : memref<1x4x8x128xf32, #tpu.memory_space<vmem>>, vector<1x1x8x128xf32>
    %417 = vector.shape_cast %416 : vector<1x1x8x128xf32> to vector<8x128xf32>
    %418 = vector.shape_cast %400 : vector<8x128xf32> to vector<1x1x8x128xf32>
    tpu.vector_store %arg3[%c0_97, %c3, %c0_98, %c0_99], %418 {strides = array<i32>} : memref<1x4x8x128xf32, #tpu.memory_space<vmem>>, vector<1x1x8x128xf32>,
    return
  }
  func.func @transform_0(%arg0: i32, %arg1: i32) -> i32 {
    %c0_i32 = arith.constant 0 : i32
    %c0_i32_0 = arith.constant 0 : i32
    return %c0_i32 : i32
  }
  func.func @transform_1(%arg0: i32, %arg1: i32) -> (i32, i32, i32, i32) {
    %c0_i32 = arith.constant 0 : i32
    %c0_i32_0 = arith.constant 0 : i32
    %c0_i32_1 = arith.constant 0 : i32
    return %arg0, %c0_i32, %arg1, %c0_i32_0 : i32, i32, i32, i32
  }
}

</mosaic_0001>

<bundles_post_ra>
// kernel: primitive_forward.1
= control target key start
LH: loop header
LB: loop body
LE: loop exit
PB: predicated region body
PF: predicated region fallthrough
CT: control target
= control target key end

     0   :  { %s692_s0 = inlined_call_operand.vmem [shape: f32[27], index: 0, kind: input, shape index: {}]   ;;  %s693_s1 = inlined_call_operand.vmem [shape: f32[1,4,8,128], index: 1, kind: output, shape index: {}]  }
   0x1   :  { %707 = sst [smem:[#allocation12_spill]] %s693_s1 }
   0x2   :  { %6 = vsyncpa [#allocation3], 0  ;;  %s13_s8 = sshll.u32 %s692_s0, 4  ;;  %s14_s8 = int_to_ptr.vmem [resolvable:$true] %s13_s8 }
   0x3   :  { %s381_s9 = scalar_lea.vmem %s14_s8, 16  ;;  %p386_p1 = scmp.lt.s32.totalorder %s14_s8, %s14_s8 }
   0x4   :  { %p382_p0 = scmp.ne.s32.totalorder %s14_s8, %s381_s9  ;;  %p387_p2 = scmp.lt.s32.totalorder %s381_s9, %s381_s9 }
   0x6   :  { %p388_p3 = por %p387_p2, %p386_p1 }
   0x8   :  { %p389_p4 = pnand %p388_p3, %p382_p0 }
   0xa   :  { %392 = shalt.err (!%p389_p4)
}
   0xb   :  { %s395_s10 = smov [#allocation2]  }
   0xc   :  { %16 = dma.vmem_to_smem %s14_s8, 16, %s395_s10, [#allocation3]  }
   0xd   :  { %393 = dma.done.wait [#allocation3], 16  }
   0xe   :  { %394 = vsyncadd [#allocation3], 4294967280 }
   0xf   :  { %20 = sfence }
  0x10   :  { %v21_v0 = vlaneseq  ;;  %s410_s11 = sld [smem:[#allocation2]]  ;;  %s412_s12 = sld [smem:[#allocation2 + $0x1]]  ;;  %v396_v18 = vmov 0.0  }
  0x11   :  { %s414_s0 = sld [smem:[#allocation2 + $0x2]]  ;;  %s416_s13 = sld [smem:[#allocation2 + $0x3]] }
  0x12   :  { %v22_v1 = vshrl.u32 %v21_v0, 7  ;;  %v24_v2 = vand.u32 127, %v21_v0  ;;  %s418_s14 = sld [smem:[#allocation2 + $0x4]]  ;;  %s420_s15 = sld [smem:[#allocation2 + $0x5]] }
  0x13   :  { %s422_s16 = sld [smem:[#allocation2 + $0x6]]  ;;  %s424_s17 = sld [smem:[#allocation2 + $0x7]] }
  0x14   :  { %v26_v3 = vmul.u32 128, %v22_v1  ;;  %s426_s18 = sld [smem:[#allocation2 + $0x8]]  ;;  %s428_s19 = sld [smem:[#allocation2 + $0x9]] }
  0x15   :  { %s430_s20 = sld [smem:[#allocation2 + $0xa]]  ;;  %s432_s21 = sld [smem:[#allocation2 + $0xb]] }
  0x16   :  { %v29_v4 = vadd.s32 %v26_v3, %v24_v2  ;;  %s434_s22 = sld [smem:[#allocation2 + $0xc]]  ;;  %s436_s23 = sld [smem:[#allocation2 + $0xd]]  ;;  %v100_v11 = vstv %s410_s11  ;;  %v102_v12 = vstv %s412_s12 }
  0x17   :  { %s438_s24 = sld [smem:[#allocation2 + $0xe]]  ;;  %s440_s25 = sld [smem:[#allocation2 + $0xf]]  ;;  %v110_v13 = vstv %s416_s13 }
  0x18   :  { %708 = sst [smem:[#allocation5_spill]] %s418_s14  ;;  %v30_v5 = vcvt.s32.f32 %v29_v4  ;;  %s444_s27 = sld [smem:[#allocation2 + $0x11]]  ;;  %v112_v14 = vstv %s418_s14 }
  0x19   :  { %s442_s26 = sld [smem:[#allocation2 + $0x10]]  ;;  %s446_s28 = sld [smem:[#allocation2 + $0x12]]  ;;  %v120_v15 = vstv %s422_s16  ;;  %v122_v16 = vstv %s424_s17 }
  0x1a   :  { %v31_v6 = vadd.f32 0.5, %v30_v5  ;;  %s448_s29 = sld [smem:[#allocation2 + $0x13]]  ;;  %s450_s30 = sld [smem:[#allocation2 + $0x14]]  ;;  %v130_v17 = vstv %s428_s19 }
  0x1b   :  { %s452_s2 = sld [smem:[#allocation2 + $0x15]]  ;;  %s454_s3 = sld [smem:[#allocation2 + $0x16]]  ;;  %v132_v25 = vstv %s430_s20 }
  0x1c   :  { %709 = sst [smem:[#allocation6_spill]] %s434_s22  ;;  %v32_v7 = vmul.f32 0.03125, %v31_v6  ;;  %v140_v26 = vstv %s434_s22  ;;  %v142_v27 = vstv %s436_s23 }
  0x1d   :  { %710 = sst [smem:[#allocation7_spill]] %s436_s23  ;;  %v150_v28 = vstv %s440_s25 }
  0x1e   :  { %711 = sst [smem:[#allocation8_spill]] %s440_s25  ;;  %v33_v8 = vfloor.f32 %v32_v7 }
  0x1f   :  { %712 = sst [smem:[#allocation9_spill]] %s442_s26  ;;  %v152_v29 = vstv %s442_s26  ;;  %v160_v30 = vstv %s446_s28 }
  0x20   :  { %713 = sst [smem:[#allocation10_spill]] %s446_s28  ;;  %v34_v9 = vmul.f32 32.0, %v33_v8  ;;  %v162_v33 = vstv %s448_s29 }
  0x21   :  { %714 = sst [smem:[#allocation11_spill]] %s454_s3  ;;  %v512_v34 = vstv %s452_s2 }
  0x22   :  { %s105_s4 = sadd.f32 %s412_s12, %s410_s11  ;;  %v35_v10 = vsub.f32 %v30_v5, %v34_v9 }
  0x23   :  { %s115_s5 = sadd.f32 %s418_s14, %s416_s13 }
  0x24   :  { %s461_s7 = smul.f32 0.25, %s105_s4  ;;  %s125_s8 = sadd.f32 %s424_s17, %s422_s16  ;;  %vm36_vm0 = vcmp.lt.f32.partialorder %v35_v10, 0.0  ;;  %vm37_vm1 = vcmp.ge.f32.partialorder %v35_v10, 32.0 }
  0x25   :  { %s465_s9 = smul.f32 0.25, %s115_s5  ;;  %s135_s10 = sadd.f32 %s430_s20, %s428_s19  ;;  %v38_v19 = vsel %vm37_vm1, 1.0, %v396_v18  ;;  %v40_v20 = vsel %vm36_vm0, 1.0, %v396_v18  ;;  %v42_v21 = vsel %vm37_vm1, 32.0, %v396_v18  ;;  %v44_v22 = vsel %vm36_vm0, 32.0, %v396_v18 }
  0x26   :  { %s471_s3 = smul.f32 0.25, %s125_s8  ;;  %s145_s1 = sadd.f32 %s436_s23, %s434_s22  ;;  %v39_v23 = vadd.f32 %v38_v19, %v33_v8  ;;  %v43_v24 = vsub.f32 %v35_v10, %v42_v21 }
  0x27   :  { %s476_s6 = smul.f32 0.25, %s135_s10  ;;  %s155_s10 = sadd.f32 %s442_s26, %s440_s25 }
  0x28   :  { %s499_s4 = smul.f32 0.25, %s145_s1  ;;  %s165_s5 = sadd.f32 %s448_s29, %s446_s28  ;;  %v41_v31 = vsub.f32 %v39_v23, %v40_v20  ;;  %v45_v32 = vadd.f32 %v44_v22, %v43_v24 }
  0x29   :  { %s506_s22 = sld [smem:[#allocation2 + $0x17]]  ;;  %s508_s14 = smul.f32 0.25, %s155_s10 }
  0x2a   :  { %s715_s8 = sadd.f32 %s414_s0, %s461_s7  ;;  %s528_s23 = smul.f32 0.25, %s165_s5  ;;  %v101_v39 = vmul.f32 %v100_v11, %v45_v32  ;;  %v103_v40 = vmul.f32 %v102_v12, %v41_v31  ;;  %v111_v41 = vmul.f32 %v110_v13, %v45_v32  ;;  %v113_v42 = vmul.f32 %v112_v14, %v41_v31 }
  0x2b   :  { %s716_s1 = sadd.f32 %s420_s15, %s465_s9  ;;  %s719_s0 = smul.f32 0.5, %s410_s11  ;;  %v121_v43 = vmul.f32 %v120_v15, %v45_v32  ;;  %v123_v44 = vmul.f32 %v122_v16, %v41_v31  ;;  %v131_v45 = vmul.f32 %v130_v17, %v45_v32  ;;  %v133_v46 = vmul.f32 %v132_v25, %v41_v31 }
  0x2c   :  { %v108_v35 = vstv %s715_s8  ;;  %s717_s26 = sadd.f32 %s426_s18, %s471_s3  ;;  %s720_s15 = smul.f32 0.0, %s412_s12  ;;  %v104_v47 = vadd.f32 %v103_v40, %v101_v39  ;;  %v114_v48 = vadd.f32 %v113_v42, %v111_v41  ;;  %v141_v49 = vmul.f32 %v140_v26, %v45_v32 }
  0x2d   :  { %v118_v36 = vstv %s716_s1  ;;  %s718_s28 = sadd.f32 %s432_s21, %s476_s6  ;;  %s201_s7 = smul.f32 0.0, %s424_s17  ;;  %v143_v50 = vmul.f32 %v142_v27, %v41_v31  ;;  %v124_v51 = vadd.f32 %v123_v44, %v121_v43  ;;  %v134_v52 = vadd.f32 %v133_v46, %v131_v45 }
  0x2e   :  { %v128_v37 = vstv %s717_s26  ;;  %s147_s25 = sadd.f32 %s438_s24, %s499_s4  ;;  %s721_s18 = sld [smem:[#allocation5_spill]]  ;;  %v151_v54 = vmul.f32 %v150_v28, %v45_v32  ;;  %v550_v55 = vadd.f32 %v108_v35, %v104_v47  ;;  %v552_v56 = vadd.f32 %v118_v36, %v114_v48 }
  0x2f   :  { %v138_v38 = vstv %s718_s28  ;;  %s534_s2 = sadd.f32 %s720_s15, %s719_s0  ;;  %s722_s21 = sld [smem:[#allocation6_spill]]  ;;  %v144_v57 = vadd.f32 %v143_v50, %v141_v49  ;;  %v153_v58 = vmul.f32 %v152_v29, %v41_v31  ;;  %v559_v59 = vadd.f32 %v128_v37, %v124_v51 }
  0x30   :  { %s157_s24 = sadd.f32 %s444_s27, %s508_s14  ;;  %s205_s26 = smul.f32 0.5, %s428_s19  ;;  %v148_v53 = vstv %s147_s25  ;;  %v561_v60 = vadd.f32 %v138_v38, %v134_v52  ;;  %v161_v62 = vmul.f32 %v160_v30, %v45_v32  ;;  %v163_v1 = vmul.f32 %v162_v33, %v41_v31 }
  0x31   :  { %s723_s28 = sld [smem:[#allocation7_spill]]  ;;  %s167_s3 = sadd.f32 %s450_s30, %s528_s23  ;;  %v568_v63 = vadd.f32 %v148_v53, %v144_v57  ;;  %v154_v0 = vadd.f32 %v153_v58, %v151_v54  ;;  %v170_v3 = vand.u32 2147483647, %v550_v55  ;;  %v171_v4 = vand.u32 2147483647, %v552_v56 }
  0x32   :  { %s206_s6 = smul.f32 0.0, %s430_s20  ;;  %s724_s9 = sld [smem:[#allocation8_spill]]  ;;  %v158_v61 = vstv %s157_s24  ;;  %v193_v5 = vstv %s534_s2  ;;  %v164_v8 = vadd.f32 %v163_v1, %v161_v62  ;;  %v602_v19 = vstv %s506_s22 }
  0x33   :  { %s725_s4 = smul.f32 0.5, %s416_s13  ;;  %s727_s27 = sld [smem:[#allocation9_spill]]  ;;  %v168_v2 = vstv %s167_s3  ;;  %v578_v7 = vadd.f32 %v158_v61, %v154_v0  ;;  %v174_v9 = vmin.f32 %v561_v60, %v568_v63  ;;  %v172_v11 = vmax.f32.f32 %v170_v3, %v171_v4 }
  0x34   :  { %s726_s5 = smul.f32 0.0, %s721_s18  ;;  %s729_s25 = sld [smem:[#allocation10_spill]]  ;;  %v194_v12 = vadd.f32 %v193_v5, %v550_v55  ;;  %v592_v15 = vadd.f32 %v168_v2, %v164_v8 }
  0x35   :  { %s210_s14 = smul.f32 0.5, %s722_s21  ;;  %s565_s1 = sadd.f32 %s206_s6, %s205_s26  ;;  %v175_v16 = vmin.f32 %v559_v59, %v174_v9  ;;  %v177_v17 = vmul.f32 %v578_v7, %v578_v7  ;;  %vm173_vm2 = vcmp.le.f32.partialorder %v172_v11, 1.0 }
  0x36   :  { %s547_s8 = sadd.f32 %s726_s5, %s725_s4  ;;  %s728_s23 = smul.f32 0.5, %s422_s16  ;;  %v178_v23 = vmul.f32 %v592_v15, %v592_v15  ;;  %v225_v28 = vand.u32 2147483647, %v194_v12  ;;  %v182_v33 = vsel %vm173_vm2, %v512_v34, 0.0 }
  0x37   :  { %s211_s10 = smul.f32 0.0, %s723_s28  ;;  %s730_s0 = sld [smem:[#allocation11_spill]]  ;;  %v208_v14 = vstv %s565_s1  ;;  %vm176_vm3 = vcmp.ge.f32.partialorder %v175_v16, 0.0 }
  0x38   :  { %s556_s30 = sadd.f32 %s201_s7, %s728_s23  ;;  %s215_s15 = smul.f32 0.5, %s724_s9  ;;  %v198_v6 = vstv %s547_s8  ;;  %v209_v20 = vadd.f32 %v208_v14, %v561_v60  ;;  %v179_v29 = vadd.f32 %v178_v23, %v177_v17  ;;  %v188_v42 = vsel %vm176_vm3, %v602_v19, 0.0 }
  0x39   :  { %s216_s7 = smul.f32 0.0, %s727_s27  ;;  %s212_s24 = sadd.f32 %s211_s10, %s210_s14  ;;  %v199_v18 = vadd.f32 %v198_v6, %v552_v56 }
  0x3a   :  { %s220_s6 = smul.f32 0.5, %s729_s25  ;;  %v203_v13 = vstv %s556_s30  ;;  %vm180_vm4 = vcmp.le.f32.partialorder %v179_v29, 1.0 }
  0x3b   :  { %s217_s3 = sadd.f32 %s216_s7, %s215_s15  ;;  %s221_s4 = smul.f32 0.0, %s448_s29  ;;  %v213_v21 = vstv %s212_s24  ;;  %v204_v24 = vadd.f32 %v203_v13, %v559_v59  ;;  %v226_v31 = vand.u32 2147483647, %v199_v18 }
  0x3c   :  { %s242_s2 = smul.f32 0.0, %s410_s11  ;;  %v214_v25 = vadd.f32 %v213_v21, %v568_v63 }
  0x3d   :  { %v583_v10 = vstv %s730_s0  ;;  %s222_s5 = sadd.f32 %s221_s4, %s220_s6  ;;  %s243_s8 = smul.f32 0.5, %s412_s12  ;;  %v218_v22 = vstv %s217_s3  ;;  %v227_v38 = vmax.f32.f32 %v225_v28, %v226_v31 }
  0x3e   :  { %s247_s23 = smul.f32 0.0, %s416_s13  ;;  %v219_v26 = vadd.f32 %v218_v22, %v578_v7  ;;  %v229_v32 = vmin.f32 %v209_v20, %v214_v25  ;;  %v185_v41 = vsel %vm180_vm4, %v583_v10, 0.0 }
  0x3f   :  { %s244_s30 = sadd.f32 %s243_s8, %s242_s2  ;;  %s248_s12 = smul.f32 0.5, %s721_s18  ;;  %v223_v27 = vstv %s222_s5  ;;  %v186_v45 = vadd.f32 %v185_v41, %v182_v33  ;;  %vm228_vm5 = vcmp.le.f32.partialorder %v227_v38, 1.0 }
  0x40   :  { %s252_s22 = smul.f32 0.0, %s422_s16  ;;  %v224_v30 = vadd.f32 %v223_v27, %v592_v15  ;;  %v232_v35 = vmul.f32 %v219_v26, %v219_v26  ;;  %v230_v39 = vmin.f32 %v204_v24, %v229_v32  ;;  %v236_v47 = vsel %vm228_vm5, %v512_v34, 0.0 }
  0x41   :  { %s731_s10 = smul.f32 0.5, %s410_s11  ;;  %s249_s0 = sadd.f32 %s248_s12, %s247_s23  ;;  %v245_v36 = vstv %s244_s30  ;;  %v189_v51 = vadd.f32 %v188_v42, %v186_v45 }
  0x42   :  { %s253_s18 = smul.f32 0.5, %s424_s17  ;;  %v233_v40 = vmul.f32 %v224_v30, %v224_v30  ;;  %v246_v43 = vadd.f32 %v245_v36, %v550_v55  ;;  %vm231_vm6 = vcmp.ge.f32.partialorder %v230_v39, 0.0 }
  0x43   :  { %s615_s1 = sadd.f32 %s243_s8, %s731_s10  ;;  %s257_s7 = smul.f32 0.0, %s428_s19  ;;  %v250_v44 = vstv %s249_s0  ;;  %v240_v52 = vsel %vm231_vm6, %v602_v19, 0.0  ;;  %v237_v61 = vadd.f32 %v236_v47, %v189_v51 }
  0x44   :  { %s732_s11 = smul.f32 0.5, %s416_s13  ;;  %s627_s3 = sadd.f32 %s253_s18, %s252_s22  ;;  %v234_v46 = vadd.f32 %v233_v40, %v232_v35  ;;  %v251_v48 = vadd.f32 %v250_v44, %v552_v56 }
  0x45   :  { %v295_v37 = vstv %s615_s1  ;;  %s258_s17 = smul.f32 0.5, %s430_s20  ;;  %s734_s22 = sld [smem:[#allocation12_spill]] }
  0x46   :  { %s625_s24 = sadd.f32 %s248_s12, %s732_s11  ;;  %s262_s13 = smul.f32 0.0, %s722_s21  ;;  %v255_v49 = vstv %s627_s3  ;;  %v296_v50 = vadd.f32 %v295_v37, %v550_v55  ;;  %vm235_vm7 = vcmp.le.f32.partialorder %v234_v46, 1.0  ;;  %v277_v55 = vand.u32 2147483647, %v246_v43 }
  0x47   :  { %s733_s4 = smul.f32 0.5, %s422_s16  ;;  %s259_s20 = sadd.f32 %s258_s17, %s257_s7  ;;  %v238_v54 = vsel %vm235_vm7, %v583_v10, 0.0  ;;  %v278_v58 = vand.u32 2147483647, %v251_v48  ;;  %v256_v62 = vadd.f32 %v255_v49, %v559_v59 }
  0x48   :  { %s263_s5 = smul.f32 0.5, %s723_s28  ;;  %s647_s16 = sadd.f32 %s258_s17, %s205_s26  ;;  %v298_v1 = vstv %s625_s24  ;;  %v239_v6 = vadd.f32 %v238_v54, %v237_v61  ;;  %v315_v26 = vand.u32 2147483647, %v296_v50 }
  0x49   :  { %s637_s2 = sadd.f32 %s253_s18, %s733_s4  ;;  %s267_s8 = smul.f32 0.0, %s724_s9  ;;  %v260_v53 = vstv %s259_s20  ;;  %v279_v3 = vmax.f32.f32 %v277_v55, %v278_v58  ;;  %v299_v4 = vadd.f32 %v298_v1, %v552_v56 }
  0x4a   :  { %s264_s28 = sadd.f32 %s263_s5, %s262_s13  ;;  %s268_s23 = smul.f32 0.5, %s727_s27  ;;  %v261_v57 = vadd.f32 %v260_v53, %v561_v60  ;;  %v304_v9 = vstv %s647_s16  ;;  %v241_v16 = vadd.f32 %v240_v52, %v239_v6 }
  0x4b   :  { %s272_s30 = smul.f32 0.0, %s729_s25  ;;  %s306_s19 = sadd.f32 %s263_s5, %s210_s14  ;;  %v301_v5 = vstv %s637_s2  ;;  %vm280_vm8 = vcmp.le.f32.partialorder %v279_v3, 1.0  ;;  %v305_v14 = vadd.f32 %v304_v9, %v561_v60  ;;  %v316_v29 = vand.u32 2147483647, %v299_v4 }
  0x4c   :  { %v265_v0 = vstv %s264_s28  ;;  %s269_s26 = sadd.f32 %s268_s23, %s267_s8  ;;  %s273_s12 = smul.f32 0.5, %s448_s29  ;;  %v288_v56 = vsel %vm280_vm8, %v512_v34, 0.0  ;;  %v302_v60 = vadd.f32 %v301_v5, %v559_v59 }
  0x4d   :  { %v266_v2 = vadd.f32 %v265_v0, %v568_v63  ;;  %s309_s27 = sadd.f32 %s268_s23, %s215_s15  ;;  %v307_v11 = vstv %s306_s19  ;;  %v289_v30 = vadd.f32 %v288_v56, %v241_v16  ;;  %v317_v33 = vmax.f32.f32 %v315_v26, %v316_v29  ;;  %s373_s9 = sld [smem:[#allocation2 + $0x18]] }
  0x4e   :  { %v270_v8 = vstv %s269_s26  ;;  %s274_s21 = sadd.f32 %s273_s12, %s272_s30  ;;  %v308_v18 = vadd.f32 %v307_v11, %v568_v63  ;;  %s374_s14 = sld [smem:[#allocation2 + $0x19]] }
  0x4f   :  { %v271_v12 = vadd.f32 %v270_v8, %v578_v7  ;;  %v281_v13 = vmin.f32 %v261_v57, %v266_v2  ;;  %s312_s29 = sadd.f32 %s273_s12, %s220_s6  ;;  %v310_v23 = vstv %s309_s27  ;;  %vm318_vm11 = vcmp.le.f32.partialorder %v317_v33, 1.0  ;;  %s375_s25 = sld [smem:[#allocation2 + $0x1a]] }
  0x50   :  { %v275_v17 = vstv %s274_s21  ;;  %v311_v24 = vadd.f32 %v310_v23, %v578_v7  ;;  %v319_v31 = vmin.f32 %v305_v14, %v308_v18  ;;  %v326_v38 = vsel %vm318_vm11, %v512_v34, 0.0 }
  0x51   :  { %v276_v20 = vadd.f32 %v275_v17, %v592_v15  ;;  %v282_v21 = vmin.f32 %v256_v62, %v281_v13  ;;  %v284_v22 = vmul.f32 %v271_v12, %v271_v12  ;;  %v313_v25 = vstv %s312_s29 }
  0x52   :  { %v314_v28 = vadd.f32 %v313_v25, %v592_v15  ;;  %v322_v32 = vmul.f32 %v311_v24, %v311_v24  ;;  %v320_v36 = vmin.f32 %v302_v60, %v319_v31 }
  0x53   :  { %v285_v27 = vmul.f32 %v276_v20, %v276_v20  ;;  %vm283_vm9 = vcmp.ge.f32.partialorder %v282_v21, 0.0  ;;  %v332_v44 = vstv %s373_s9 }
  0x54   :  { %v323_v35 = vmul.f32 %v314_v28, %v314_v28  ;;  %v292_v59 = vsel %vm283_vm9, %v602_v19, 0.0  ;;  %vm321_vm13 = vcmp.ge.f32.partialorder %v320_v36, 0.0  ;;  %v335_v45 = vstv %s374_s14 }
  0x55   :  { %v286_v63 = vadd.f32 %v285_v27, %v284_v22  ;;  %v330_v42 = vsel %vm321_vm13, %v602_v19, 0.0  ;;  %v339_v46 = vstv %s375_s25 }
  0x56   :  { %v324_v7 = vadd.f32 %v323_v35, %v322_v32 }
  0x57   :  { %vm287_vm10 = vcmp.le.f32.partialorder %v286_v63, 1.0 }
  0x58   :  { %v290_v37 = vsel %vm287_vm10, %v583_v10, 0.0  ;;  %vm325_vm12 = vcmp.le.f32.partialorder %v324_v7, 1.0 }
  0x59   :  { %v291_v15 = vadd.f32 %v290_v37, %v289_v30  ;;  %v328_v40 = vsel %vm325_vm12, %v583_v10, 0.0 }
  0x5b   :  { %v293_v39 = vadd.f32 %v292_v59, %v291_v15 }
  0x5d   :  { %v327_v41 = vadd.f32 %v326_v38, %v293_v39 }
  0x5f   :  { %v329_v43 = vadd.f32 %v328_v40, %v327_v41 }
  0x61   :  { %v331_v47 = vadd.f32 %v330_v42, %v329_v43 }
  0x63   :  { %v333_v48 = vmul.f32 %v332_v44, %v331_v47  ;;  %378 = vst [vmem:[%s734_s22 + $0x18] sm:$0xff] %v331_v47  ;;  %v336_v49 = vmul.f32 %v335_v45, %v331_v47  ;;  %v340_v50 = vmul.f32 %v339_v46, %v331_v47 }
  0x65   :  { %334 = vst [vmem:[%s734_s22] sm:$0xff] %v333_v48  ;;  %376 = vst [vmem:[%s734_s22 + $0x8] sm:$0xff] %v336_v49 }
  0x66   :  { %377 = vst [vmem:[%s734_s22 + $0x10] sm:$0xff] %v340_v50 }
  0x67   :  { %349 = vsyncpa [#allocation3], 1 }

</bundles_post_ra>
